<compile_context>
chip_gen: v5e
topology: v5e:2x2
jax: 0.10.0
libtpu: 0.0.40
codegen_flags: <defaults>
</compile_context>

<pallas_src>
import functools

import jax
import jax.numpy as jnp
from jax.experimental import pallas as pl
from jax.experimental.pallas import tpu as pltpu

_LANE = 128
_SUBLANE = 8
_K_TILE_THRESHOLD = 512  # only tile the reduction axis past this size


def _round_up(x, m):
    return (x + m - 1) // m * m


def _choose_tile_k(k_pad):
    """Reduction tile: full K for small K, else 512/256/128 (K pre-padded to 128)."""
    if k_pad <= _K_TILE_THRESHOLD or k_pad % _LANE != 0:
        return k_pad
    for cand in (512, 256, 128):
        if k_pad % cand == 0:
            return cand
    return k_pad


def _choose_batch_tiling(batch):
    """Returns (tile_b, padded_batch). Prefers 256-row tiles (full MXU) and
    >=2 grid steps on the batch axis so both v7x TensorCores are used."""
    if batch >= 512:
        return 256, _round_up(batch, 256)
    if batch >= 16:
        batch_p = _round_up(batch, 16)
        return batch_p // 2, batch_p        # exactly 2 parallel batch steps
    batch_p = _round_up(batch, _SUBLANE)
    return batch_p, batch_p                 # tiny batch: single step


def _shared_encoder_kernel(x_ref, wt_ref, b_ref, o_ref, acc_ref):
    # x_ref  : (tile_b, tile_k)   compute dtype (f32 or bf16)
    # wt_ref : (tile_k, tile_n)   compute dtype (pre-transposed weight)
    # b_ref  : (1, tile_n)        float32
    # o_ref  : (tile_b, tile_n)   output dtype
    # acc_ref: (tile_b, tile_n)   float32 VMEM accumulator
    k = pl.program_id(2)

    @pl.when(k == 0)
    def _():
        acc_ref[...] = jnp.zeros_like(acc_ref)

    acc_ref[...] += jnp.dot(
        x_ref[...], wt_ref[...], preferred_element_type=jnp.float32
    )

    @pl.when(k == pl.num_programs(2) - 1)
    def _():
        y = acc_ref[...] + b_ref[...]           # bias broadcast over batch rows
        o_ref[...] = jnp.maximum(y, 0.0).astype(o_ref.dtype)


def prepare_shared_encoder_params(weight, bias, *, compute_dtype=jnp.bfloat16):
    """One-time parameter prep (hoisted out of the forward pass).

    weight: (hidden_size, input_dim) nn.Linear layout; bias: (hidden_size,).
    Returns (wt, b2) with wt = W.T padded to (K_pad, N_pad) in compute_dtype and
    b2 = bias padded to (1, N_pad) in float32.
    """
    hidden_size, input_dim = weight.shape
    n_pad = _round_up(hidden_size, _LANE)
    k_pad = (_round_up(input_dim, _LANE)
             if input_dim > _K_TILE_THRESHOLD else input_dim)
    wt = jnp.transpose(weight).astype(compute_dtype)          # (K, N)
    wt = jnp.pad(wt, ((0, k_pad - input_dim), (0, n_pad - hidden_size)))
    b2 = jnp.pad(bias.astype(jnp.float32), (0, n_pad - hidden_size))
    return wt, b2.reshape(1, n_pad)


@functools.partial(jax.jit, static_argnames=("hidden_size",))
def shared_encoder_forward(x, wt, b2, *, hidden_size):
    """relu(x @ W.T + b).  wt/b2 come from prepare_shared_encoder_params."""
    batch, input_dim = x.shape
    k_pad, n_pad = wt.shape
    out_dtype = x.dtype
    compute_dtype = wt.dtype

    tile_b, batch_p = _choose_batch_tiling(batch)
    tile_k = _choose_tile_k(k_pad)
    tile_n = 256 if n_pad % 256 == 0 else 128

    # Pad batch (sublane/tile alignment) and K (to the prepared weight's K),
    # then cast activations to the compute dtype at the pallas_call boundary.
    x_p = x
    if batch_p != batch or k_pad != input_dim:
        x_p = jnp.pad(x, ((0, batch_p - batch), (0, k_pad - input_dim)))
    x_p = x_p.astype(compute_dtype)

    grid = (batch_p // tile_b, n_pad // tile_n, k_pad // tile_k)

    el = jnp.dtype(compute_dtype).itemsize
    cost = pl.CostEstimate(
        flops=2 * batch_p * k_pad * n_pad,
        transcendentals=0,
        bytes_accessed=(batch_p * k_pad * el            # x
                        + k_pad * n_pad * el            # W^T
                        + n_pad * 4                     # bias
                        + batch_p * n_pad * jnp.dtype(out_dtype).itemsize),  # y
    )

    y_p = pl.pallas_call(
        _shared_encoder_kernel,
        out_shape=jax.ShapeDtypeStruct((batch_p, n_pad), out_dtype),
        grid_spec=pltpu.PrefetchScalarGridSpec(
            num_scalar_prefetch=0,
            grid=grid,
            in_specs=[
                pl.BlockSpec((tile_b, tile_k), lambda i, j, k: (i, k)),
                pl.BlockSpec((tile_k, tile_n), lambda i, j, k: (k, j)),
                pl.BlockSpec((1, tile_n), lambda i, j, k: (0, j)),
            ],
            out_specs=pl.BlockSpec((tile_b, tile_n), lambda i, j, k: (i, j)),
            scratch_shapes=[pltpu.VMEM((tile_b, tile_n), jnp.float32)],
        ),
        compiler_params=pltpu.CompilerParams(
            dimension_semantics=("parallel", "parallel", "arbitrary"),
        ),
        cost_estimate=cost,
    )(x_p, wt, b2)

    # Strip batch / hidden padding.
    return y_p[:batch, :hidden_size]


def init_shared_encoder_params(key, input_dim, hidden_size):
    """Deterministic init mimicking nn.Linear's uniform(-1/sqrt(fan_in), 1/sqrt(fan_in))."""
    kw, kb = jax.random.split(key)
    bound = 1.0 / jnp.sqrt(jnp.float32(input_dim))
    weight = jax.random.uniform(
        kw, (hidden_size, input_dim), jnp.float32, minval=-bound, maxval=bound
    )
    bias = jax.random.uniform(
        kb, (hidden_size,), jnp.float32, minval=-bound, maxval=bound
    )
    return weight, bias


if __name__ == "__main__":
    key = jax.random.PRNGKey(0)
    k_x, k_p, k_x2, k_p2 = jax.random.split(key, 4)

    # --- small demo at module-consistent shapes, f32 operands (strict check) ---
    batch, input_dim, hidden_size = 8, 16, 32
    x = jax.random.normal(k_x, (batch, input_dim), jnp.float32)
    weight, bias = init_shared_encoder_params(k_p, input_dim, hidden_size)

    wt32, b2 = prepare_shared_encoder_params(weight, bias, compute_dtype=jnp.float32)
    y = jax.block_until_ready(
        shared_encoder_forward(x, wt32, b2, hidden_size=hidden_size))
    y_ref = jnp.maximum(x @ weight.T + bias, 0.0)
    assert y.shape == (batch, hidden_size)
    assert jnp.allclose(y, y_ref, atol=1e-5, rtol=1e-5)

    # --- bf16-operand / f32-accumulate path; exercises batch, N and K tiling
    #     plus padding of a non-128-multiple hidden size ---
    batch2, input_dim2, hidden2 = 64, 1024, 200
    x2 = jax.random.normal(k_x2, (batch2, input_dim2), jnp.float32)
    w2, bi2 = init_shared_encoder_params(k_p2, input_dim2, hidden2)
    wt_bf16, b2_2 = prepare_shared_encoder_params(w2, bi2, compute_dtype=jnp.bfloat16)
    y2 = jax.block_until_ready(
        shared_encoder_forward(x2, wt_bf16, b2_2, hidden_size=hidden2))
    y2_ref = jnp.maximum(x2 @ w2.T + bi2, 0.0)
    assert y2.shape == (batch2, hidden2)
    assert jnp.allclose(y2, y2_ref, atol=5e-2, rtol=5e-2)

    print("KERNEL_OK")
</pallas_src>

<mosaic_0001>
module attributes {stable_mosaic.version = 11 : i64} {
  func.func @_shared_encoder_kernel(%arg0: i32, %arg1: i32, %arg2: i32, %arg3: memref<8x16xf32, #tpu.memory_space<vmem>>, %arg4: memref<16x128xf32, #tpu.memory_space<vmem>>, %arg5: memref<1x128xf32, #tpu.memory_space<vmem>>, %arg6: memref<8x128xf32, #tpu.memory_space<vmem>>, %arg7: memref<8x128xf32, #tpu.memory_space<vmem>>) attributes {dimension_semantics = [#tpu.dimension_semantics<parallel>, #tpu.dimension_semantics<parallel>, #tpu.dimension_semantics<arbitrary>], iteration_bounds = array<i64: 1, 1, 1>, scalar_prefetch = 0 : i64, scratch_operands = 1 : i64, tpu.core_type = #tpu.core_type<tc>, window_params = [{transform_indices = @transform_0, window_bounds = array<i64: 8, 16>}, {transform_indices = @transform_1, window_bounds = array<i64: 16, 128>}, {transform_indices = @transform_2, window_bounds = array<i64: 1, 128>}, {transform_indices = @transform_3, window_bounds = array<i64: 8, 128>}]} {
    %c0_i32 = arith.constant 0 : i32
    %0 = arith.cmpi eq, %arg2, %c0_i32 : i32
    %1 = arith.extui %0 : i1 to i32
    %c0_i32_0 = arith.constant 0 : i32
    %2 = arith.cmpi ne, %1, %c0_i32_0 : i32
    scf.if %2 {
      %cst_10 = arith.constant 0.000000e+00 : f32
      %12 = vector.broadcast %cst_10 : f32 to vector<8x128xf32>
      %c0_11 = arith.constant 0 : index
      %c0_12 = arith.constant 0 : index
      %13 = vector.load %arg7[%c0_11, %c0_12] : memref<8x128xf32, #tpu.memory_space<vmem>>, vector<8x128xf32>
      tpu.vector_store %arg7[%c0_11, %c0_12], %12 {strides = array<i32>} : memref<8x128xf32, #tpu.memory_space<vmem>>, vector<8x128xf32>,
    } else {
    }
    %c0 = arith.constant 0 : index
    %c0_1 = arith.constant 0 : index
    %3 = vector.load %arg7[%c0, %c0_1] : memref<8x128xf32, #tpu.memory_space<vmem>>, vector<8x128xf32>
    %c0_2 = arith.constant 0 : index
    %c0_3 = arith.constant 0 : index
    %4 = vector.load %arg3[%c0_2, %c0_3] : memref<8x16xf32, #tpu.memory_space<vmem>>, vector<8x16xf32>
    %c0_4 = arith.constant 0 : index
    %c0_5 = arith.constant 0 : index
    %5 = vector.load %arg4[%c0_4, %c0_5] : memref<16x128xf32, #tpu.memory_space<vmem>>, vector<16x128xf32>
    %cst = arith.constant dense<0.000000e+00> : vector<8x128xf32>
    %6 = tpu.matmul %4, %5, %cst {dimension_numbers = #tpu.dot_dimension_numbers<[1], [0], [0], [1], [0, 0, 1, 1], [], []>} : vector<8x16xf32>, vector<16x128xf32>, vector<8x128xf32> -> vector<8x128xf32>
    %7 = arith.addf %3, %6 : vector<8x128xf32>
    %c0_6 = arith.constant 0 : index
    %c0_7 = arith.constant 0 : index
    %8 = vector.load %arg7[%c0_6, %c0_7] : memref<8x128xf32, #tpu.memory_space<vmem>>, vector<8x128xf32>
    tpu.vector_store %arg7[%c0_6, %c0_7], %7 {strides = array<i32>} : memref<8x128xf32, #tpu.memory_space<vmem>>, vector<8x128xf32>,
    %c0_i32_8 = arith.constant 0 : i32
    %9 = arith.cmpi eq, %arg2, %c0_i32_8 : i32
    %10 = arith.extui %9 : i1 to i32
    %c0_i32_9 = arith.constant 0 : i32
    %11 = arith.cmpi ne, %10, %c0_i32_9 : i32
    scf.if %11 {
      %c0_10 = arith.constant 0 : index
      %c0_11 = arith.constant 0 : index
      %12 = vector.load %arg7[%c0_10, %c0_11] : memref<8x128xf32, #tpu.memory_space<vmem>>, vector<8x128xf32>
      %c0_12 = arith.constant 0 : index
      %c0_13 = arith.constant 0 : index
      %13 = vector.load %arg5[%c0_12, %c0_13] : memref<1x128xf32, #tpu.memory_space<vmem>>, vector<1x128xf32>
      %14 = vector.broadcast %13 : vector<1x128xf32> to vector<8x128xf32>
      %15 = arith.addf %12, %14 : vector<8x128xf32>
      %cst_14 = arith.constant 0.000000e+00 : f32
      %16 = vector.broadcast %cst_14 : f32 to vector<8x128xf32>
      %17 = arith.maximumf %15, %16 : vector<8x128xf32>
      %c0_15 = arith.constant 0 : index
      %c0_16 = arith.constant 0 : index
      %18 = vector.load %arg6[%c0_15, %c0_16] : memref<8x128xf32, #tpu.memory_space<vmem>>, vector<8x128xf32>
      tpu.vector_store %arg6[%c0_15, %c0_16], %17 {strides = array<i32>} : memref<8x128xf32, #tpu.memory_space<vmem>>, vector<8x128xf32>,
    } else {
    }
    return
  }
  func.func @transform_0(%arg0: i32, %arg1: i32, %arg2: i32) -> (i32, i32) {
    %c0_i32 = arith.constant 0 : i32
    return %arg0, %arg2 : i32, i32
  }
  func.func @transform_1(%arg0: i32, %arg1: i32, %arg2: i32) -> (i32, i32) {
    %c0_i32 = arith.constant 0 : i32
    return %arg2, %arg1 : i32, i32
  }
  func.func @transform_2(%arg0: i32, %arg1: i32, %arg2: i32) -> (i32, i32) {
    %c0_i32 = arith.constant 0 : i32
    %c0_i32_0 = arith.constant 0 : i32
    return %c0_i32, %arg1 : i32, i32
  }
  func.func @transform_3(%arg0: i32, %arg1: i32, %arg2: i32) -> (i32, i32) {
    %c0_i32 = arith.constant 0 : i32
    return %arg0, %arg1 : i32, i32
  }
}

</mosaic_0001>

<bundles_post_ra>
// kernel: shared_encoder_forward.1
= control target key start
LH: loop header
LB: loop body
LE: loop exit
PB: predicated region body
PF: predicated region fallthrough
CT: control target
= control target key end

     0   :  { %8 = vsyncpa [#allocation4], 0  ;;  %s231_s0 = inlined_call_operand.hbm [shape: f32[8,16], index: 0, kind: input, shape index: {}]   ;;  %s232_s1 = inlined_call_operand.hbm [shape: f32[16,128], index: 1, kind: input, shape index: {}]   ;;  %s233_s2 = inlined_call_operand.vmem [shape: f32[1,128], index: 2, kind: input, shape index: {}]   ;;  %s234_s3 = inlined_call_operand.hbm [shape: f32[8,128], index: 3, kind: output, shape index: {}]  }
   0x1   :  { %9 = vsyncpa [#allocation7], 0 }
   0x2   :  { %10 = vsyncpa [#allocation5], 0  ;;  %s16_s14 = sshll.u32 %s231_s0, 4  ;;  %s194_s15 = smov [#allocation3]   ;;  %s17_s14 = int_to_ptr.hbm [resolvable:$true] %s16_s14 }
   0x3   :  { %s18_s16 = sshll.u32 %s194_s15, 4  ;;  %s26_s19 = sshll.u32 %s232_s1, 4  ;;  %s19_s16 = int_to_ptr.vmem [resolvable:$true] %s18_s16  ;;  %s27_s19 = int_to_ptr.hbm [resolvable:$true] %s26_s19 }
   0x4   :  { %21 = dma.hbm_to_vmem [thread:$0]  %s17_s14, 128, %s19_s16, [#allocation4]  }
   0x5   :  { %s195_s20 = smov [#allocation6]   ;;  %s196_s22 = smov 128  }
   0x6   :  { %s28_s21 = sshll.u32 %s195_s20, 4  ;;  %s197_s23 = smov 8   ;;  %s29_s21 = int_to_ptr.vmem [resolvable:$true] %s28_s21 }
   0x7   :  { %34 = dma.hbm_to_vmem [thread:$0]  %s27_s19, 256, %s29_s21, [#allocation7], %s196_s22, %s196_s22, %s197_s23  }
   0x8   :  { %188 = dma.done.wait [#allocation4], 128  }
   0x9   :  { %189 = vsyncadd [#allocation4], 4294967168 }
   0xa   :  { %190 = dma.done.wait [#allocation7], 256  }
   0xb   :  { %191 = vsyncadd [#allocation7], 4294967040  ;;  %v53_v0 = vld [vmem:[#allocation6 + $0x8] sm:$0xff]  ;;  %v52_v1 = vld [vmem:[#allocation6] sm:$0xff]  ;;  %vm54_vm0 = vcmask 130048   ;;  %s198_s24 = smov [#allocation8]  }
   0xc   :  { %72 = vmatpush.msra.mxu0 %v53_v0  ;;  %v51_v2 = vld [vmem:[#allocation3] sm:$0xff]  ;;  %s96_s25 = sshll.u32 %s198_s24, 4  ;;  %s98_s28 = sshll.u32 %s234_s3, 4  ;;  %s97_s25 = int_to_ptr.vmem [resolvable:$true] %s96_s25  ;;  %s99_s28 = int_to_ptr.hbm [resolvable:$true] %s98_s28 }
   0xd   :  { %v115_v3 = vld [vmem:[%s233_s2] ss:$0 sm:$0xff] }
   0xe   :  { %73 = vmatpush.msra.mxu0 %v52_v1 }
   0xf   :  { %109 = vmatmul.msk.f32.vlgmr.msra.gmra.mxu0 %vm54_vm0, %v51_v2 }
  0x8c   :  { %v75_v4 = vpop.f32.mrf.mxu0 }
  0x8d   :  { %v88_v5 = vadd.f32 %v115_v3, %v75_v4 }
  0x8f   :  { %v89_v6 = vmax.f32 %v88_v5, 0.0 }
  0x91   :  { %90 = vst [vmem:[#allocation8] sm:$0xff] %v89_v6 }
  0x92   :  { %101 = dma.vmem_to_hbm [thread:$0]  %s97_s25, 128, %s99_s28, [#allocation5]  }
  0x93   :  { %192 = dma.done.wait [#allocation5], 128  }
  0x94   :  { %193 = vsyncadd [#allocation5], 4294967168 }
  0x95   :  { %106 = vsyncpa [#allocation4], 1 }
  0x96   :  { %107 = vsyncpa [#allocation7], 1 }
  0x97   :  { %108 = vsyncpa [#allocation5], 1 }

</bundles_post_ra>
